<compile_context>
chip_gen: v7x
topology: tpu7x:2x2x1
jax: 0.10.0
libtpu: 0.0.40
codegen_flags: <defaults>
</compile_context>

<pallas_src>
import jax
import jax.numpy as jnp
import numpy as np
from jax.experimental import pallas as pl
from jax.experimental.pallas import tpu as pltpu


def _round_up(x, m):
    return (x + m - 1) // m * m


# ---------------------------------------------------------------------------
# Kernel 1: per-node feature transform fused with the source-side norm
#   x = (f @ w) * rsqrt(clamp(out_deg, 1))        (f32 accumulate, bf16 out)
# ---------------------------------------------------------------------------
def _transform_kernel(f_ref, w_ref, norm_ref, out_ref):
    t = jnp.dot(f_ref[...], w_ref[...], preferred_element_type=jnp.float32)
    out_ref[...] = (t * norm_ref[...]).astype(out_ref.dtype)


def _transform(f, w, norm, *, row_tile=128):
    n, in_feats = f.shape
    fp = w.shape[1]
    n_pad = _round_up(max(n, 8), row_tile)
    if n_pad != n:
        f = jnp.pad(f, ((0, n_pad - n), (0, 0)))
        norm = jnp.pad(norm, ((0, n_pad - n), (0, 0)), constant_values=1.0)
    out = pl.pallas_call(
        _transform_kernel,
        out_shape=jax.ShapeDtypeStruct((n_pad, fp), jnp.bfloat16),
        grid=(n_pad // row_tile,),
        in_specs=[
            pl.BlockSpec((row_tile, in_feats), lambda i: (i, 0)),
            pl.BlockSpec((in_feats, fp), lambda i: (0, 0)),
            pl.BlockSpec((row_tile, 1), lambda i: (i, 0)),
        ],
        out_specs=pl.BlockSpec((row_tile, fp), lambda i: (i, 0)),
        compiler_params=pltpu.CompilerParams(
            dimension_semantics=("parallel",)),
    )(f, w, norm)
    return out[:n]


# ---------------------------------------------------------------------------
# Kernel 2: tiled aggregation  rst = relu((A @ x) * rsqrt(clamp(in_deg, 1)))
#   grid = (dst tiles, src tiles); src (reduction) axis last / 'arbitrary';
#   f32 accumulator in VMEM scratch, init/finalize gated with pl.when.
# ---------------------------------------------------------------------------
def _aggregate_kernel(adj_ref, x_ref, norm_in_ref, out_ref, acc_ref):
    @pl.when(pl.program_id(1) == 0)
    def _():
        acc_ref[...] = jnp.zeros_like(acc_ref)

    acc_ref[...] += jnp.dot(adj_ref[...], x_ref[...],
                            preferred_element_type=jnp.float32)

    @pl.when(pl.program_id(1) == pl.num_programs(1) - 1)
    def _():
        rst = acc_ref[...] * norm_in_ref[...]
        out_ref[...] = jnp.maximum(rst, 0.0).astype(out_ref.dtype)


def _aggregate(adj_bf16, x, norm_in, *, tm, tk,
               vmem_limit_bytes=48 * 1024 * 1024):
    m_pad, k_pad = adj_bf16.shape
    fp = x.shape[1]
    return pl.pallas_call(
        _aggregate_kernel,
        out_shape=jax.ShapeDtypeStruct((m_pad, fp), jnp.float32),
        grid_spec=pltpu.PrefetchScalarGridSpec(
            num_scalar_prefetch=0,
            grid=(m_pad // tm, k_pad // tk),
            in_specs=[
                pl.BlockSpec((tm, tk), lambda i, k: (i, k)),
                pl.BlockSpec((tk, fp), lambda i, k: (k, 0)),
                pl.BlockSpec((tm, 1), lambda i, k: (i, 0)),
            ],
            out_specs=pl.BlockSpec((tm, fp), lambda i, k: (i, 0)),
            scratch_shapes=[pltpu.VMEM((tm, fp), jnp.float32)],
        ),
        compiler_params=pltpu.CompilerParams(
            dimension_semantics=("parallel", "arbitrary"),
            vmem_limit_bytes=vmem_limit_bytes),
    )(adj_bf16, x, norm_in)


# ---------------------------------------------------------------------------
# Graph preprocessing (one-time per static graph): degrees -> rsqrt norms,
# bf16 cast and tile-aligned zero-padding of the dense adjacency.
#   adj[dst, src] = 1.0 iff edge src -> dst, node order = [u nodes, v nodes].
# ---------------------------------------------------------------------------
def prepare_graph(adj, *, tm=256, tk=512):
    n = adj.shape[0]
    adj = adj.astype(jnp.float32)
    out_deg = jnp.sum(adj, axis=0).reshape(n, 1)           # out-degree (src)
    in_deg = jnp.sum(adj, axis=1).reshape(n, 1)            # in-degree (dst)
    norm_out = jax.lax.rsqrt(jnp.maximum(out_deg, 1.0))
    norm_in = jax.lax.rsqrt(jnp.maximum(in_deg, 1.0))

    m_pad = _round_up(n, tm)
    k_pad = _round_up(n, tk)
    adj_p = jnp.pad(adj, ((0, m_pad - n), (0, k_pad - n))).astype(jnp.bfloat16)
    norm_in_p = jnp.pad(norm_in, ((0, m_pad - n), (0, 0)), constant_values=1.0)
    return dict(adj=adj_p, norm_out=norm_out, norm_in=norm_in_p,
                num_nodes=n, tm=tm, tk=tk)


def dgl_layer_forward(graph, u_f, v_f, u_w, v_w, *, row_tile=128):
    nu, nv = u_f.shape[0], v_f.shape[0]
    n = graph["num_nodes"]
    assert n == nu + nv
    out_feats = u_w.shape[1]
    fp = _round_up(out_feats, 128)          # lane-dense output width

    # Zero-pad weights to the lane-dense width; cast operands to bf16
    # (fp32 MXU accumulation keeps the matmuls accurate).
    u_w_p = jnp.pad(u_w, ((0, 0), (0, fp - out_feats))).astype(jnp.bfloat16)
    v_w_p = jnp.pad(v_w, ((0, 0), (0, fp - out_feats))).astype(jnp.bfloat16)
    u_fb = u_f.astype(jnp.bfloat16)
    v_fb = v_f.astype(jnp.bfloat16)

    norm_out = graph["norm_out"]
    x_u = _transform(u_fb, u_w_p, norm_out[:nu], row_tile=row_tile)
    x_v = _transform(v_fb, v_w_p, norm_out[nu:], row_tile=row_tile)
    # Stitch the two small (rows, Fp) halves in HBM; the N^2 adjacency is
    # never reshuffled and no concat happens inside a kernel.
    x = jnp.concatenate([x_u, x_v], axis=0)
    k_pad = graph["adj"].shape[1]
    if k_pad != n:
        x = jnp.pad(x, ((0, k_pad - n), (0, 0)))

    rst = _aggregate(graph["adj"], x, graph["norm_in"],
                     tm=graph["tm"], tk=graph["tk"])
    return rst[:n, :out_feats]


def xavier_uniform(key, shape, dtype=jnp.float32):
    fan_in, fan_out = shape
    limit = float(np.sqrt(6.0 / (fan_in + fan_out)))
    return jax.random.uniform(key, shape, dtype, minval=-limit, maxval=limit)


if __name__ == "__main__":
    key = jax.random.PRNGKey(0)
    k_uf, k_vf, k_uw, k_vw, k_adj = jax.random.split(key, 5)

    num_u, num_v = 192, 192
    n_total = num_u + num_v
    in_feats, out_feats = 64, 16

    u_f = jax.random.normal(k_uf, (num_u, in_feats), jnp.float32)
    v_f = jax.random.normal(k_vf, (num_v, in_feats), jnp.float32)
    u_w = xavier_uniform(k_uw, (in_feats, out_feats))
    v_w = xavier_uniform(k_vw, (in_feats, out_feats))

    # Deterministic random graph: adj[dst, src] = 1 if edge src -> dst.
    adj = jax.random.bernoulli(k_adj, 0.05, (n_total, n_total)).astype(jnp.float32)

    # Small demo tiles so the (384, 384) adjacency gives a real (3, 3) grid;
    # for production graphs use the defaults (tm=256, tk=512) or larger.
    graph = prepare_graph(adj, tm=128, tk=128)
    out = dgl_layer_forward(graph, u_f, v_f, u_w, v_w, row_tile=128)
    out = jax.block_until_ready(out)

    # Pure-JAX reference of the DGLLayer semantics.  Features/weights are
    # rounded through bf16 to mirror the (exact-for-adj) bf16 streaming the
    # optimized kernel uses; everything else is f32.
    u_f32 = u_f.astype(jnp.bfloat16).astype(jnp.float32)
    v_f32 = v_f.astype(jnp.bfloat16).astype(jnp.float32)
    u_w32 = u_w.astype(jnp.bfloat16).astype(jnp.float32)
    v_w32 = v_w.astype(jnp.bfloat16).astype(jnp.float32)
    node_f = jnp.concatenate([u_f32 @ u_w32, v_f32 @ v_w32], axis=0)
    out_deg = jnp.clip(jnp.sum(adj, axis=0), 1.0, None).reshape(-1, 1)
    in_deg = jnp.clip(jnp.sum(adj, axis=1), 1.0, None).reshape(-1, 1)
    ref = jnp.maximum((adj @ (node_f * out_deg ** -0.5)) * in_deg ** -0.5, 0.0)
    np.testing.assert_allclose(np.asarray(out), np.asarray(ref),
                               rtol=1e-2, atol=1e-2)

    print("KERNEL_OK")
</pallas_src>

<mosaic_0001>
module attributes {stable_mosaic.version = 11 : i64} {
  func.func @_transform_kernel(%arg0: i32, %arg1: memref<128x64xbf16, #tpu.memory_space<vmem>>, %arg2: memref<64x128xbf16, #tpu.memory_space<vmem>>, %arg3: memref<128x1xf32, #tpu.memory_space<vmem>>, %arg4: memref<128x128xbf16, #tpu.memory_space<vmem>>) attributes {dimension_semantics = [#tpu.dimension_semantics<parallel>], iteration_bounds = array<i64: 2>, scalar_prefetch = 0 : i64, scratch_operands = 0 : i64, tpu.core_type = #tpu.core_type<tc>, window_params = [{transform_indices = @transform_0, window_bounds = array<i64: 128, 64>}, {pipeline_mode = #tpu.pipeline_mode<synchronous>, transform_indices = @transform_1, window_bounds = array<i64: 64, 128>}, {transform_indices = @transform_2, window_bounds = array<i64: 128, 1>}, {transform_indices = @transform_3, window_bounds = array<i64: 128, 128>}]} {
    %c0 = arith.constant 0 : index
    %c0_0 = arith.constant 0 : index
    %0 = vector.load %arg1[%c0, %c0_0] : memref<128x64xbf16, #tpu.memory_space<vmem>>, vector<128x64xbf16>
    %c0_1 = arith.constant 0 : index
    %c0_2 = arith.constant 0 : index
    %1 = vector.load %arg2[%c0_1, %c0_2] : memref<64x128xbf16, #tpu.memory_space<vmem>>, vector<64x128xbf16>
    %cst = arith.constant dense<0.000000e+00> : vector<128x128xf32>
    %2 = tpu.matmul %0, %1, %cst {dimension_numbers = #tpu.dot_dimension_numbers<[1], [0], [0], [1], [0, 0, 1, 1], [], []>} : vector<128x64xbf16>, vector<64x128xbf16>, vector<128x128xf32> -> vector<128x128xf32>
    %c0_3 = arith.constant 0 : index
    %c0_4 = arith.constant 0 : index
    %3 = vector.load %arg3[%c0_3, %c0_4] : memref<128x1xf32, #tpu.memory_space<vmem>>, vector<128x1xf32>
    %4 = vector.broadcast %3 : vector<128x1xf32> to vector<128x128xf32>
    %5 = arith.mulf %2, %4 : vector<128x128xf32>
    %6 = arith.truncf %5 : vector<128x128xf32> to vector<128x128xbf16>
    %c0_5 = arith.constant 0 : index
    %c0_6 = arith.constant 0 : index
    %7 = vector.load %arg4[%c0_5, %c0_6] : memref<128x128xbf16, #tpu.memory_space<vmem>>, vector<128x128xbf16>
    tpu.vector_store %arg4[%c0_5, %c0_6], %6 {strides = array<i32>} : memref<128x128xbf16, #tpu.memory_space<vmem>>, vector<128x128xbf16>,
    return
  }
  func.func @transform_0(%arg0: i32) -> (i32, i32) {
    %c0_i32 = arith.constant 0 : i32
    %c0_i32_0 = arith.constant 0 : i32
    return %arg0, %c0_i32 : i32, i32
  }
  func.func @transform_1(%arg0: i32) -> (i32, i32) {
    %c0_i32 = arith.constant 0 : i32
    %c0_i32_0 = arith.constant 0 : i32
    %c0_i32_1 = arith.constant 0 : i32
    return %c0_i32, %c0_i32_0 : i32, i32
  }
  func.func @transform_2(%arg0: i32) -> (i32, i32) {
    %c0_i32 = arith.constant 0 : i32
    %c0_i32_0 = arith.constant 0 : i32
    return %arg0, %c0_i32 : i32, i32
  }
  func.func @transform_3(%arg0: i32) -> (i32, i32) {
    %c0_i32 = arith.constant 0 : i32
    %c0_i32_0 = arith.constant 0 : i32
    return %arg0, %c0_i32 : i32, i32
  }
}

</mosaic_0001>

<bundles_post_ra>
// kernel: tpu_custom_call.1
= control target key start
LH: loop header
LB: loop body
LE: loop exit
PB: predicated region body
PF: predicated region fallthrough
CT: control target
= control target key end

     0   :  { %8 = vsyncpa [#allocation3], 0  ;;  %s1155_s0 = inlined_call_operand.vmem [shape: bf16[256,64], index: 0, kind: input, shape index: {}]   ;;  %s1156_s1 = inlined_call_operand.vmem [shape: bf16[64,128], index: 1, kind: input, shape index: {}]   ;;  %s1157_s2 = inlined_call_operand.vmem [shape: f32[256,1], index: 2, kind: input, shape index: {}]   ;;  %s1158_s3 = inlined_call_operand.hbm [shape: bf16[256,128], index: 3, kind: output, shape index: {}]  }
   0x1   :  { %10 = vsyncpa [#allocation3 + $0x1], 0  ;;  %s987_s12 = smov 0   ;;  %s989_s13 = smov 0  }
   0x2   :  { %s991_s14 = smov 0   ;;  %s993_s15 = smov 0  }
   0x3 LB: > { %s1008_s16 = sadd.s32 4294967295, %s961_s15   ;;  %s685_s17 = sadd.s32 4294967294, %s961_s15   ;;  %s961_s15 = sphi %s993_s15, %s1164_s15   ;;  %s957_s14 = sphi %s991_s14, %s1163_s14   ;;  %s953_s13 = sphi %s989_s13, %s1162_s13   ;;  %s949_s12 = sphi %s987_s12, %s1161_s12  }
   0x4   : > { %s1012_s18 = sadd.s32 1, %s961_s15   ;;  %s96_s19 = sadd.s32 1, %s957_s14 }
   0x5   : > { %s93_s20 = ssub.s32 %s961_s15, %s1012_s18  ;;  %p106_p0 = scmp.ne.s32.totalorder %s957_s14, %s953_s13 }
   0x6   : > { %p94_p1 = scmp.eq.s32.totalorder %s93_s20, 0  ;;  %p107_p2 = scmp.eq.s32.totalorder %s1008_s16, 1 }
   0x7   : > { %p112_p3 = scmp.ne.s32.totalorder %s953_s13, %s949_s12  ;;  %p113_p4 = scmp.eq.s32.totalorder %s685_s17, 1 }
   0x8   : > { %s1023_s21 = scalar_select %p94_p1, %s957_s14, %s96_s19  }
   0x9   : > { %p1025_p5 = por %p107_p2, %p106_p0  ;;  %p1029_p6 = por %p113_p4, %p112_p3 }
   0xa   : > { %p688_p7 = scmp.ge.s32.totalorder %s961_s15, 1  ;;  %p152_p8 = scmp.lt.s32.totalorder %s961_s15, 3 }
   0xc   : > { %p153_p9 = pnand %p688_p7, %p152_p8 }
   0xd   : > { %v887_v0 = vld [vmem:[%s1156_s1] sm:$0xff] (!%p153_p9)   ;;  %s690_s26 = sshll.u32 (!%p153_p9), %s1008_s16, 4  ;;  %v888_v1 = vld [vmem:[%s1156_s1 + $0x8] sm:$0xff] (!%p153_p9)   ;;  %v889_v2 = vld [vmem:[%s1156_s1 + $0x10] sm:$0xff] (!%p153_p9)   ;;  %v963_v3 = vmov (!%p153_p9), 0   ;;  %vm283_vm0 = vcmask (!%p153_p9), 523264  }
   0xe   : > { %156 = sbr.rel (%p153_p9) target bundleno = 272 (0x110), region = 32  ;;  %p182_p10 = scmp.lt.s32.totalorder (!%p153_p9), %s690_s26, 31  ;;  %811 = vmatprep.subr.bf16.mxu0 (!%p153_p9), %v887_v0  ;;  %835 = vmatprep.subr.bf16.mxu1 (!%p153_p9), %v887_v0  ;;  %v890_v4 = vld [vmem:[%s1156_s1 + $0x18] sm:$0xff] (!%p153_p9)  }
   0xf   : > { %812 = vmatpush3.bf16.msra.mxu0 (!%p153_p9), %v887_v0  ;;  %839 = vmatpush3.bf16.msra.mxu1 (!%p153_p9), %v887_v0  ;;  %s178_s20 = sand.u32 (!%p153_p9), 1, %s953_s13   ;;  %s964_s5 = smov (!%p153_p9), [#allocation2]  }
  0x10   : > { %813 = vmatprep.subr.bf16.mxu0 (!%p153_p9), %v888_v1  ;;  %836 = vmatprep.subr.bf16.mxu1 (!%p153_p9), %v888_v1  ;;  %s689_s24 = sshll.u32 (!%p153_p9), %s178_s20, 6  ;;  %s1114_s30 = scalar_lea.sflag (!%p153_p9), [#allocation3], %s178_s20 }
  0x11   : > { %886 = vset.pattern.permute.xlu1 (!%p153_p9), %v963_v3  ;;  %885 = vset.pattern.permute.xlu0 (!%p153_p9), %v963_v3  ;;  %s1093_s25 = scalar_lea.vmem (!%p153_p9), [#allocation2], %s689_s24  ;;  %s903_s6 = sshll.u32 (!%p153_p9), %s964_s5, 4  ;;  %s904_s6 = int_to_ptr.vmem [resolvable:$false] %s903_s6 }
  0x12   : > { %s611_s27 = sshll.u32 (!%p153_p9), %s1093_s25, 4  ;;  %s905_s7 = scalar_lea.vmem (!%p153_p9), %s904_s6, 2048  ;;  %s1106_s27 = int_to_ptr.vmem [resolvable:$true] %s611_s27 }
  0x13   : > { %814 = vmatpush3.bf16.msra.mxu0 (!%p153_p9), %v888_v1  ;;  %840 = vmatpush3.bf16.msra.mxu1 (!%p153_p9), %v888_v1  ;;  %p906_p0 = scmp.lt.s32.totalorder (!%p153_p9), %s1106_s27, %s904_s6 }
  0x14   : > { %815 = vmatprep.subr.bf16.mxu0 (!%p153_p9), %v889_v2  ;;  %837 = vmatprep.subr.bf16.mxu1 (!%p153_p9), %v889_v2 }
  0x15   : > { %s1166_s26 = smov (!%p182_p10, %s690_s26), 31 }
  0x16   : > { %s691_s4 = sshll.u32 %s1166_s26, 2  ;;  %s693_s10 = sshll.u32 %s1166_s26, 3 }
  0x17   : > { %s1051_s9 = scalar_lea.vmem %s1155_s0, %s691_s4  ;;  %816 = vmatpush3.bf16.msra.mxu0 %v889_v2  ;;  %841 = vmatpush3.bf16.msra.mxu1 %v889_v2  ;;  %s1061_s19 = scalar_lea.vmem %s1157_s2, %s693_s10 }
  0x18   : > { %v891_v5 = vld [vmem:[%s1051_s9] sm:$0xff]   ;;  %817 = vmatprep.subr.bf16.mxu0 %v890_v4  ;;  %838 = vmatprep.subr.bf16.mxu1 %v890_v4  ;;  %v893_v7 = vld [vmem:[%s1051_s9 + $0x8] sm:$0xff]   ;;  %v895_v9 = vld [vmem:[%s1051_s9 + $0x10] sm:$0xff]   ;;  %s751_s26 = sshll.u32 %s1008_s16, 10  ;;  %s899_s4 = scalar_lea.vmem %s1106_s27, 1024 }
  0x19   : > { %v892_v6 = vld [vmem:[%s1051_s9 + $0x20] sm:$0xff]   ;;  %819 = vmatprep.mubr.msk.bf16.mxu0 %vm283_vm0, %v891_v5  ;;  %v894_v8 = vld [vmem:[%s1051_s9 + $0x28] sm:$0xff]   ;;  %v896_v10 = vld [vmem:[%s1051_s9 + $0x30] sm:$0xff]   ;;  %s1104_s29 = scalar_lea.hbm %s1158_s3, %s751_s26  ;;  %p900_p11 = scmp.ne.s32.totalorder %s1106_s27, %s899_s4 }
  0x1a   : > { %827 = vmatprep.mubr.msk.bf16.mxu1 %vm283_vm0, %v892_v6  ;;  %v407_v11 = vld [vmem:[%s1061_s19 + $0x10] sm:$0xff]  ;;  %v405_v12 = vld [vmem:[%s1061_s19] sm:$0xff]  ;;  %v408_v13 = vld [vmem:[%s1061_s19 + $0x18] sm:$0xff]  ;;  %p907_p1 = scmp.lt.s32.totalorder %s905_s7, %s899_s4 }
  0x1b   : > { %818 = vmatpush3.bf16.msra.mxu0 %v890_v4  ;;  %842 = vmatpush3.bf16.msra.mxu1 %v890_v4  ;;  %v406_v14 = vld [vmem:[%s1061_s19 + $0x8] sm:$0xff]  ;;  %v409_v16 = vld [vmem:[%s1061_s19 + $0x20] sm:$0xff]  ;;  %v897_v17 = vld [vmem:[%s1051_s9 + $0x18] sm:$0xff]   ;;  %p901_p12 = pnand %p900_p11, %p1025_p5 }
  0x1c   : > { %433 = vperm.xlu1 %886, %v407_v11   ;;  %423 = vperm.xlu0 %885, %v405_v12   ;;  %v410_v15 = vld [vmem:[%s1061_s19 + $0x28] sm:$0xff]  ;;  %v898_v18 = vld [vmem:[%s1051_s9 + $0x38] sm:$0xff]   ;;  %v411_v20 = vld [vmem:[%s1061_s19 + $0x30] sm:$0xff]  ;;  %p908_p2 = por %p907_p1, %p906_p0 }
  0x1d   : > { %v412_v19 = vld [vmem:[%s1061_s19 + $0x38] sm:$0xff]  ;;  %v414_v21 = vld [vmem:[%s1061_s19 + $0x48] sm:$0xff]  ;;  %v413_v22 = vld [vmem:[%s1061_s19 + $0x40] sm:$0xff]  ;;  %p902_p13 = pneg %p901_p12 }
  0x1e   : > { %820 = vmatmul.mubr.msk.bf16.vlgmr.msra.gmra.mrb[0].mxu0 %vm283_vm0, %v893_v7  ;;  %828 = vmatmul.mubr.msk.bf16.vlgmr.msra.gmra.mrb[0].mxu1 %vm283_vm0, %v894_v8  ;;  %v416_v23 = vld [vmem:[%s1061_s19 + $0x58] sm:$0xff]  ;;  %v415_v24 = vld [vmem:[%s1061_s19 + $0x50] sm:$0xff]  ;;  %v418_v25 = vld [vmem:[%s1061_s19 + $0x68] sm:$0xff] }
  0x1f   : > { %823 = vmatprep.mubr.msk.bf16.mxu0 %vm283_vm0, %v895_v9  ;;  %831 = vmatprep.mubr.msk.bf16.mxu1 %vm283_vm0, %v896_v10  ;;  %v417_v26 = vld [vmem:[%s1061_s19 + $0x60] sm:$0xff]  ;;  %v420_v27 = vld [vmem:[%s1061_s19 + $0x78] sm:$0xff]  ;;  %v419_v28 = vld [vmem:[%s1061_s19 + $0x70] sm:$0xff]  ;;  %p909_p3 = pnand %p908_p2, %p902_p13 }
  0x20   : > { %438 = vperm.xlu1 %886, %v408_v13   ;;  %428 = vperm.xlu0 %885, %v406_v14  }
  0x24   : > { %448 = vperm.xlu1 %886, %v410_v15   ;;  %443 = vperm.xlu0 %885, %v409_v16  }
  0x26   : > { %824 = vmatmul.mubr.msk.bf16.gmra.mrb[4].mxu0 %vm283_vm0, %v897_v17  ;;  %832 = vmatmul.mubr.msk.bf16.gmra.mrb[4].mxu1 %vm283_vm0, %v898_v18 }
  0x28   : > { %458 = vperm.xlu1 %886, %v412_v19   ;;  %453 = vperm.xlu0 %885, %v411_v20  }
  0x2c   : > { %468 = vperm.xlu1 %886, %v414_v21   ;;  %463 = vperm.xlu0 %885, %v413_v22  }
  0x30   : > { %478 = vperm.xlu1 %886, %v416_v23   ;;  %473 = vperm.xlu0 %885, %v415_v24  }
  0x34   : > { %488 = vperm.xlu1 %886, %v418_v25   ;;  %483 = vperm.xlu0 %885, %v417_v26  }
  0x38   : > { %498 = vperm.xlu1 %886, %v420_v27   ;;  %493 = vperm.xlu0 %885, %v419_v28  }
  0x9b   : > { %v434_v29 = vpop.permute.xlu1 %433  ;;  %v424_v30 = vpop.permute.xlu0 %423 }
  0x9f   : > { %v439_v31 = vpop.permute.xlu1 %438  ;;  %v429_v32 = vpop.permute.xlu0 %428 }
  0xa3   : > { %v449_v33 = vpop.permute.xlu1 %448  ;;  %v444_v34 = vpop.permute.xlu0 %443 }
  0xa7   : > { %v459_v35 = vpop.permute.xlu1 %458  ;;  %v454_v36 = vpop.permute.xlu0 %453 }
  0xab   : > { %v469_v37 = vpop.permute.xlu1 %468  ;;  %v464_v38 = vpop.permute.xlu0 %463 }
  0xaf   : > { %v479_v39 = vpop.permute.xlu1 %478  ;;  %v474_v40 = vpop.permute.xlu0 %473 }
  0xb3   : > { %v489_v41 = vpop.permute.xlu1 %488  ;;  %v484_v42 = vpop.permute.xlu0 %483 }
  0xb7   : > { %v499_v63 = vpop.permute.xlu1 %498  ;;  %v494_v0 = vpop.permute.xlu0 %493 }
  0xf1   : > { %v821_v43 = vpop.f32.mrb[0].mxu0  ;;  %v829_v44 = vpop.f32.mrb[0].mxu1 }
  0xf2   : > { %v342_v45 = vpop.f32.mrb[1].mxu0  ;;  %v374_v46 = vpop.f32.mrb[1].mxu1  ;;  %v503_v49 = vmul.f32 %v821_v43, %v434_v29  ;;  %v511_v50 = vmul.f32 %v829_v44, %v474_v40 }
  0xf3   : > { %v822_v47 = vpop.f32.mrb[2].mxu0  ;;  %v830_v48 = vpop.f32.mrb[2].mxu1  ;;  %v501_v55 = vmul.f32 %v424_v30, %v342_v45  ;;  %v509_v56 = vmul.f32 %v464_v38, %v374_v46 }
  0xf4   : > { %v504_v51 = vmul.f32 %v822_v47, %v439_v31  ;;  %v512_v52 = vmul.f32 %v830_v48, %v479_v39  ;;  %v345_v53 = vpop.f32.mrb[3].mxu0  ;;  %v377_v54 = vpop.f32.mrb[3].mxu1 }
  0xf5   : > { %v502_v57 = vmul.f32 %v429_v32, %v345_v53  ;;  %v510_v58 = vmul.f32 %v469_v37, %v377_v54 }
  0xf6   : > { %v760_v59 = vpack.c.bf16 %v504_v51, %v503_v49  ;;  %v780_v60 = vpack.c.bf16 %v512_v52, %v511_v50 }
  0xf7   : > { %v755_v61 = vpack.c.bf16 %v502_v57, %v501_v55  ;;  %v775_v62 = vpack.c.bf16 %v510_v58, %v509_v56 }
  0xf8   : > { %792 = vst [vmem:[%s1093_s25 + $0x8] sm:$0xff] %v760_v59   ;;  %796 = vst [vmem:[%s1093_s25 + $0x28] sm:$0xff] %v780_v60  }
  0xf9   : > { %756 = vst [vmem:[%s1093_s25] sm:$0xff] %v755_v61   ;;  %795 = vst [vmem:[%s1093_s25 + $0x20] sm:$0xff] %v775_v62   ;;  %v825_v1 = vpop.f32.mrb[4].mxu0  ;;  %v833_v2 = vpop.f32.mrb[4].mxu1 }
  0xfa   : > { %v358_v3 = vpop.f32.mrb[5].mxu0  ;;  %v390_v4 = vpop.f32.mrb[5].mxu1  ;;  %v507_v7 = vmul.f32 %v825_v1, %v454_v36  ;;  %v515_v8 = vmul.f32 %v833_v2, %v494_v0 }
  0xfb   : > { %v826_v5 = vpop.f32.mrb[6].mxu0  ;;  %v834_v6 = vpop.f32.mrb[6].mxu1  ;;  %v505_v13 = vmul.f32 %v444_v34, %v358_v3  ;;  %v513_v14 = vmul.f32 %v484_v42, %v390_v4 }
  0xfc   : > { %v508_v9 = vmul.f32 %v826_v5, %v459_v35  ;;  %v516_v10 = vmul.f32 %v834_v6, %v499_v63  ;;  %v361_v11 = vpop.f32.mrb[7].mxu0  ;;  %v393_v12 = vpop.f32.mrb[7].mxu1 }
  0xfd   : > { %v506_v15 = vmul.f32 %v449_v33, %v361_v11  ;;  %v514_v16 = vmul.f32 %v489_v41, %v393_v12 }
  0xfe   : > { %v770_v17 = vpack.c.bf16 %v508_v9, %v507_v7  ;;  %v790_v18 = vpack.c.bf16 %v516_v10, %v515_v8 }
  0xff   : > { %v765_v19 = vpack.c.bf16 %v506_v15, %v505_v13  ;;  %v785_v20 = vpack.c.bf16 %v514_v16, %v513_v14 }
 0x100   : > { %794 = vst [vmem:[%s1093_s25 + $0x18] sm:$0xff] %v770_v17   ;;  %798 = vst [vmem:[%s1093_s25 + $0x38] sm:$0xff] %v790_v18  }
 0x101   : > { %793 = vst [vmem:[%s1093_s25 + $0x10] sm:$0xff] %v765_v19   ;;  %797 = vst [vmem:[%s1093_s25 + $0x30] sm:$0xff] %v785_v20  }
 0x102   : > { %912 = shalt.err (!%p909_p3)
}
 0x103   : > { %s913_s8 = scalar_lea.hbm %s1104_s29, 1024  ;;  %s917_s11 = scalar_lea.hbm %s1158_s3, 2048 }
 0x104   : > { %p914_p4 = scmp.ne.s32.totalorder %s1104_s29, %s913_s8  ;;  %p918_p9 = scmp.lt.u32.totalorder %s1104_s29, %s1158_s3 }
 0x105   : > { %p919_p10 = scmp.lt.u32.totalorder %s917_s11, %s913_s8  ;;  %p921_p12 = scmp.lt.u32.totalorder %s913_s8, %s1104_s29 }
 0x106   : > { %p915_p7 = pnand %p914_p4, %p1025_p5 }
 0x107   : > { %p920_p11 = por %p919_p10, %p918_p9 }
 0x108   : > { %p916_p8 = pneg %p915_p7 }
 0x109   : > { %p922_p13 = por %p921_p12, %p920_p11 }
 0x10b   : > { %p923_p0 = pnand %p922_p13, %p916_p8 }
 0x10d   : > { %926 = shalt.err (!%p923_p0)
}
 0x10e   : > { %s965_s20 = smov 64   ;;  %s966_s24 = smov 4  }
 0x10f   : > { %843 = dma.vmem_to_hbm [thread:$0]  (%p1025_p5), %s1106_s27, 1024, %s1104_s29, %s1114_s30, %s965_s20, %s965_s20, %s966_s24  }
 0x110 PF: > { %p849_p1 = scmp.ge.s32.totalorder %s961_s15, 2  ;;  %s626_s25 = sand.u32 1, %s949_s12  }
 0x111   : > { %s627_s26 = scalar_lea.sflag [#allocation3], %s626_s25 }
 0x112   : > { %p846_p2 = pnand %p849_p1, %p1029_p6 }
 0x114   : > { %944 = dma.done.wait (!%p846_p2), %s627_s26, 1024  }
 0x115   : > { %946 = vsyncadd (!%p846_p2), %s627_s26, 4294966272  ;;  %p13_p3 = scmp.ge.s32.totalorder %s1012_s18, 4   ;;  %s1161_s12 = smov %s953_s13 }
 0x116   : > { %s1162_s13 = smov %s957_s14  ;;  %s1163_s14 = smov %s1023_s21 }
 0x117   : > { %s1164_s15 = smov %s1012_s18  ;;  %15 = sbr.rel (!%p13_p3) target bundleno = 3 (0x3), region = 70 }
 0x11e   :  { %632 = vsyncpa [#allocation3], 1 }
 0x11f   :  { %634 = vsyncpa [#allocation3 + $0x1], 1 }

</bundles_post_ra>
